<compile_context>
chip_gen: v7x
topology: tpu7x:2x2x1
jax: 0.10.0
libtpu: 0.0.40
codegen_flags: <defaults>
</compile_context>

<pallas_src>
import functools

import jax
import jax.numpy as jnp
from jax.experimental import pallas as pl
from jax.experimental.pallas import tpu as pltpu

EPS = 1e-5


# ---------------------------------------------------------------------------
# In-kernel layer norms on a (bblk*N, D) slab (seq in sublanes, dim in lanes).
# Both use the one-pass variance (independent reductions) and EUP rsqrt.
# ---------------------------------------------------------------------------
def _ln_seq(y, alpha, beta, bblk, N, D):
    # LN_v2(seq): normalize over seq *per batch element* (groups of N rows).
    yb = y.reshape(bblk, N, D)
    m = jnp.mean(yb, axis=1, keepdims=True)
    m2 = jnp.mean(yb * yb, axis=1, keepdims=True)
    inv = jax.lax.rsqrt(m2 - m * m + EPS)
    yn = ((yb - m) * inv).reshape(bblk * N, D)
    return yn * alpha + beta                     # params pre-broadcast to (R, D)


def _ln_dim(y, alpha, beta):
    # LN(dim): normalize over dim = the lane axis.
    m = jnp.mean(y, axis=-1, keepdims=True)
    m2 = jnp.mean(y * y, axis=-1, keepdims=True)
    inv = jax.lax.rsqrt(m2 - m * m + EPS)
    return (y - m) * inv * alpha + beta


# ---------------------------------------------------------------------------
# Kernel: one grid step processes `bblk` batch elements, whole network fused.
# ---------------------------------------------------------------------------
def dpknet_kernel(num_layers, num_distill, bblk, N, D,
                  x_ref, wt1_ref, wt2_ref, pp_ref, wo_ref, out_ref):
    R = bblk * N
    LL = max(num_layers, num_distill)

    # (bblk, N, D) -> (bblk*N, D) slab; dim stays in lanes for the whole body.
    X = x_ref[...].reshape(R, D)

    # motion_fc_in (weight pre-transposed, bias pre-broadcast host-side).
    w_in_t = pp_ref[0:D, :]
    b_in = pp_ref[D:D + R, :]
    H = jnp.dot(X, w_in_t, preferred_element_type=jnp.float32) + b_in

    F = H          # MotionBlock chain state  (f)
    G = H          # distiller  chain state  (g)
    base0 = D + R
    for l in range(LL):
        base = base0 + l * 7 * R
        has_f = l < num_layers
        has_g = l < num_distill
        ft_b     = pp_ref[base + 0 * R: base + 1 * R, :]
        ft_alpha = pp_ref[base + 1 * R: base + 2 * R, :]
        ft_beta  = pp_ref[base + 2 * R: base + 3 * R, :]
        n0_alpha = pp_ref[base + 3 * R: base + 4 * R, :]
        n0_beta  = pp_ref[base + 4 * R: base + 5 * R, :]
        kd_alpha = pp_ref[base + 5 * R: base + 6 * R, :]
        kd_beta  = pp_ref[base + 6 * R: base + 7 * R, :]

        y = zg = None
        if has_f and has_g:
            # Fused fc_temporal(F) / distiller-fc0(G): one block-diag matmul on
            # the sublane-stacked [F; G] slab (the two chains are independent).
            S = jnp.concatenate([F, G], axis=0)                     # (2R, D)
            T = jnp.dot(wt1_ref[l], S, preferred_element_type=jnp.float32)
            y, zg = T[:R] + ft_b, T[R:]
        elif has_f:
            y = jnp.dot(wt1_ref[l, 0:R, 0:R], F,
                        preferred_element_type=jnp.float32) + ft_b
        else:
            zg = jnp.dot(wt1_ref[l, R:2 * R, 0:R], G,
                         preferred_element_type=jnp.float32)

        if has_f:
            # MotionBlock: LN_v2(seq) -> fc0(temporal) -> LN(dim) -> residual.
            y = _ln_seq(y, ft_alpha, ft_beta, bblk, N, D)
            # fc0's bias is constant along dim and cancels exactly in the
            # LN(dim) that follows -> folded away (see wrapper note).
            Z = jnp.dot(wt2_ref[l], F + y, preferred_element_type=jnp.float32)
            F = F + _ln_dim(Z, n0_alpha, n0_beta)
        if has_g:
            # KnowledgeDistiller: fc0 (already in zg) -> LN(dim) -> residual.
            G = G + _ln_dim(zg, kd_alpha, kd_beta)

    # Fused output projections: [F | G] @ blockdiag(W_out^T, W_dist^T) + bias.
    FG = jnp.concatenate([F, G], axis=-1)                           # (R, 2D)
    OUT = (jnp.dot(FG, wo_ref[0:2 * D, :], preferred_element_type=jnp.float32)
           + wo_ref[2 * D:2 * D + R, :])
    out_ref[...] = OUT.reshape(bblk, N, 2 * D).astype(out_ref.dtype)


# ---------------------------------------------------------------------------
# Wrapper: host-side weight fusion/packing + pallas_call.
# ---------------------------------------------------------------------------
def dpknet_forward(x, p, num_layers, num_distill):
    B, N, D = x.shape
    L, Ld = num_layers, num_distill
    LL, Lc = max(L, Ld), min(L, Ld)

    # Megacore split only when each block carries enough work (>~1 us); at the
    # tested (B=2, N=8, D=32) a single grid step avoids a duplicated prologue
    # and a second set of output DMAs on every generation (v5e/v6e/v7x).
    num_blocks = 2 if (B >= 8 and B % 2 == 0) else 1
    bblk = B // num_blocks
    R = bblk * N

    eye = jnp.eye(bblk, dtype=jnp.float32)

    def bdiag(w):                       # (N, N) -> batch-block-diagonal (R, R)
        return jnp.kron(eye, w.astype(jnp.float32))

    def seq_param(v):                   # (N,) -> (R, D): tile batch, bcast lanes
        return jnp.tile(v.reshape(N, 1), (bblk, D)).astype(jnp.float32)

    def dim_param(v):                   # (D,) -> (R, D): bcast rows
        return jnp.broadcast_to(v.reshape(1, D), (R, D)).astype(jnp.float32)

    zero = jnp.zeros((R, D), jnp.float32)

    # --- fused temporal weights: blockdiag(kron(I,ft_W), kron(I,kd_W)) ------
    wt1_blocks = []
    for l in range(LL):
        blk = jnp.zeros((2 * R, 2 * R), jnp.float32)
        if l < Lc:
            blk = blk.at[0:R, 0:R].set(bdiag(p["ft_W"][l]))
            blk = blk.at[R:2 * R, R:2 * R].set(bdiag(p["kd_W"][l]))
        elif l < L:                      # f-chain-only tail layer
            blk = blk.at[0:R, 0:R].set(bdiag(p["ft_W"][l]))
        else:                            # g-chain-only tail layer
            blk = blk.at[R:2 * R, 0:R].set(bdiag(p["kd_W"][l]))
        wt1_blocks.append(blk)
    wt1 = jnp.stack(wt1_blocks)                                   # (LL, 2R, 2R)

    wt2 = jnp.stack([bdiag(p["f0_W"][l]) for l in range(L)])      # (L, R, R)

    # --- packed (rows, D) parameter slab, everything pre-broadcast ----------
    # NOTE: f0_b / kd_b are omitted on purpose: they are constant along the
    # dim axis and cancel exactly inside the LN(dim) that immediately follows
    # each of those linears (norm_axis='spatial', with_normalization=True),
    # so the forward output is mathematically identical without them.
    rows = [p["W_in"].T.astype(jnp.float32), dim_param(p["b_in"])]
    for l in range(LL):
        rows += [
            seq_param(p["ft_b"][l]) if l < L else zero,
            seq_param(p["ft_alpha"][l]) if l < L else zero,
            seq_param(p["ft_beta"][l]) if l < L else zero,
            dim_param(p["n0_alpha"][l]) if l < L else zero,
            dim_param(p["n0_beta"][l]) if l < L else zero,
            dim_param(p["kd_alpha"][l]) if l < Ld else zero,
            dim_param(p["kd_beta"][l]) if l < Ld else zero,
        ]
    pp = jnp.concatenate(rows, axis=0)                 # (D + R + 7*R*LL, D)

    # --- fused output projection: blockdiag(W_out^T, W_dist^T) + biases -----
    w_od = jnp.zeros((2 * D, 2 * D), jnp.float32)
    w_od = w_od.at[0:D, 0:D].set(p["W_out"].T)
    w_od = w_od.at[D:2 * D, D:2 * D].set(p["W_dist"].T)
    b_od = jnp.concatenate([dim_param(p["b_out"]), dim_param(p["b_dist"])],
                           axis=-1)                    # (R, 2D)
    wo = jnp.concatenate([w_od, b_od], axis=0)         # (2D + R, 2D)

    def wspec(shape):
        nd = len(shape)
        return pl.BlockSpec(shape, lambda i, _nd=nd: (0,) * _nd)

    kernel = functools.partial(dpknet_kernel, L, Ld, bblk, N, D)
    out = pl.pallas_call(
        kernel,
        out_shape=jax.ShapeDtypeStruct((B, N, 2 * D), jnp.float32),
        grid_spec=pltpu.PrefetchScalarGridSpec(
            num_scalar_prefetch=0,
            grid=(num_blocks,),
            in_specs=[pl.BlockSpec((bblk, N, D), lambda i: (i, 0, 0)),
                      wspec(wt1.shape), wspec(wt2.shape),
                      wspec(pp.shape), wspec(wo.shape)],
            out_specs=pl.BlockSpec((bblk, N, 2 * D), lambda i: (i, 0, 0)),
        ),
        compiler_params=pltpu.CompilerParams(
            dimension_semantics=("parallel",) if num_blocks > 1 else ("arbitrary",)),
    )(x, wt1, wt2, pp, wo)

    return out[..., :D], out[..., D:]


# ---------------------------------------------------------------------------
# Deterministic parameter construction (shapes follow the PyTorch __init__).
# NOTE: the original module initializes weights with xavier_uniform_(gain=1e-8),
# biases to 0 and LN alpha/beta to 1/0.  We use a larger gain and small random
# biases / LN affine params so the numerical check is non-trivial (forward
# semantics are identical regardless of init values).
# ---------------------------------------------------------------------------
def xavier_uniform(key, shape, gain):
    fan_out, fan_in = shape
    bound = gain * (6.0 / (fan_in + fan_out)) ** 0.5
    return jax.random.uniform(key, shape, jnp.float32, -bound, bound)


def make_params(key, dim, seq, num_layers, num_distill, gain=1e-2):
    keys = iter(jax.random.split(key, 64))

    def small(shape):
        return 0.1 * jax.random.normal(next(keys), shape, jnp.float32)

    p = {}
    p["W_in"] = xavier_uniform(next(keys), (dim, dim), gain)
    p["b_in"] = small((dim,))
    p["W_out"] = xavier_uniform(next(keys), (dim, dim), gain)
    p["b_out"] = small((dim,))
    p["W_dist"] = xavier_uniform(next(keys), (dim, dim), gain)
    p["b_dist"] = small((dim,))

    L, Ld = num_layers, num_distill
    p["ft_W"] = jnp.stack([xavier_uniform(next(keys), (seq, seq), gain)
                           for _ in range(L)])
    p["ft_b"] = small((L, seq))
    p["ft_alpha"] = 1.0 + small((L, seq))
    p["ft_beta"] = small((L, seq))
    p["f0_W"] = jnp.stack([xavier_uniform(next(keys), (seq, seq), gain)
                           for _ in range(L)])
    p["f0_b"] = small((L, seq))
    p["n0_alpha"] = 1.0 + small((L, dim))
    p["n0_beta"] = small((L, dim))

    p["kd_W"] = jnp.stack([xavier_uniform(next(keys), (seq, seq), gain)
                           for _ in range(Ld)])
    p["kd_b"] = small((Ld, seq))
    p["kd_alpha"] = 1.0 + small((Ld, dim))
    p["kd_beta"] = small((Ld, dim))
    return p


# Pure-JAX reference of the same forward (mirrors the PyTorch (b, d, n) path,
# including the fc0/kd biases that the kernel folds away).
def reference(x, p, num_layers, num_distill):
    def ln_v2(y, a, b):
        m = y.mean(-1, keepdims=True)
        v = ((y - m) ** 2).mean(-1, keepdims=True)
        return (y - m) / jnp.sqrt(v + EPS) * a.reshape(1, 1, -1) + b.reshape(1, 1, -1)

    def ln_sp(y, a, b):
        m = y.mean(1, keepdims=True)
        v = ((y - m) ** 2).mean(1, keepdims=True)
        return (y - m) / jnp.sqrt(v + EPS) * a.reshape(1, -1, 1) + b.reshape(1, -1, 1)

    h = x @ p["W_in"].T + p["b_in"]
    f0 = jnp.transpose(h, (0, 2, 1))                    # (B, D, N)

    f = f0
    for l in range(num_layers):
        y = f @ p["ft_W"][l].T + p["ft_b"][l]
        y = ln_v2(y, p["ft_alpha"][l], p["ft_beta"][l])
        z = (f + y) @ p["f0_W"][l].T + p["f0_b"][l]
        z = ln_sp(z, p["n0_alpha"][l], p["n0_beta"][l])
        f = f + z

    g = f0
    for l in range(num_distill):
        z = g @ p["kd_W"][l].T + p["kd_b"][l]
        z = ln_sp(z, p["kd_alpha"][l], p["kd_beta"][l])
        g = g + z

    hm = jnp.transpose(f, (0, 2, 1)) @ p["W_out"].T + p["b_out"]
    dk = jnp.transpose(g, (0, 2, 1)) @ p["W_dist"].T + p["b_dist"]
    return hm, dk


if __name__ == "__main__":
    # config.motion.dim == config.motion_mlp.hidden_dim = 32,
    # config.motion_mlp.seq_len = 8, num_layers = 2, distill_layer_num = 2,
    # with_normalization=True, spatial_fc_only=False, norm_axis='spatial'
    B, SEQ, DIM = 2, 8, 32
    NUM_LAYERS, NUM_DISTILL = 2, 2

    key = jax.random.PRNGKey(0)
    kx, kp = jax.random.split(key)
    x = jax.random.normal(kx, (B, SEQ, DIM), jnp.float32)     # motion_input: (b, n, d)
    params = make_params(kp, DIM, SEQ, NUM_LAYERS, NUM_DISTILL)

    hm, dk = dpknet_forward(x, params, NUM_LAYERS, NUM_DISTILL)
    jax.block_until_ready((hm, dk))

    hm_ref, dk_ref = reference(x, params, NUM_LAYERS, NUM_DISTILL)
    assert hm.shape == (B, SEQ, DIM) and dk.shape == (B, SEQ, DIM)
    assert jnp.allclose(hm, hm_ref, atol=1e-5, rtol=1e-4)
    assert jnp.allclose(dk, dk_ref, atol=1e-5, rtol=1e-4)

    print("KERNEL_OK")
</pallas_src>

<mosaic_0001>
module attributes {stable_mosaic.version = 11 : i64} {
  func.func @dpknet_kernel(%arg0: i32, %arg1: memref<2x8x32xf32, #tpu.memory_space<vmem>>, %arg2: memref<2x32x32xf32, #tpu.memory_space<vmem>>, %arg3: memref<2x16x16xf32, #tpu.memory_space<vmem>>, %arg4: memref<272x32xf32, #tpu.memory_space<vmem>>, %arg5: memref<80x64xf32, #tpu.memory_space<vmem>>, %arg6: memref<2x8x64xf32, #tpu.memory_space<vmem>>) attributes {dimension_semantics = [#tpu.dimension_semantics<arbitrary>], iteration_bounds = array<i64: 1>, scalar_prefetch = 0 : i64, scratch_operands = 0 : i64, tpu.core_type = #tpu.core_type<tc>, window_params = [{transform_indices = @transform_0, window_bounds = array<i64: 2, 8, 32>}, {pipeline_mode = #tpu.pipeline_mode<synchronous>, transform_indices = @transform_1, window_bounds = array<i64: 2, 32, 32>}, {pipeline_mode = #tpu.pipeline_mode<synchronous>, transform_indices = @transform_2, window_bounds = array<i64: 2, 16, 16>}, {pipeline_mode = #tpu.pipeline_mode<synchronous>, transform_indices = @transform_3, window_bounds = array<i64: 272, 32>}, {pipeline_mode = #tpu.pipeline_mode<synchronous>, transform_indices = @transform_4, window_bounds = array<i64: 80, 64>}, {transform_indices = @transform_5, window_bounds = array<i64: 2, 8, 64>}]} {
    %c0 = arith.constant 0 : index
    %c0_0 = arith.constant 0 : index
    %c0_1 = arith.constant 0 : index
    %0 = vector.load %arg1[%c0, %c0_0, %c0_1] : memref<2x8x32xf32, #tpu.memory_space<vmem>>, vector<2x8x32xf32>
    %1 = vector.shape_cast %0 : vector<2x8x32xf32> to vector<16x32xf32>
    %c0_2 = arith.constant 0 : index
    %c0_3 = arith.constant 0 : index
    %2 = vector.load %arg4[%c0_2, %c0_3] : memref<272x32xf32, #tpu.memory_space<vmem>>, vector<32x32xf32>
    %c32 = arith.constant 32 : index
    %c0_4 = arith.constant 0 : index
    %3 = vector.load %arg4[%c32, %c0_4] : memref<272x32xf32, #tpu.memory_space<vmem>>, vector<16x32xf32>
    %cst = arith.constant dense<0.000000e+00> : vector<16x32xf32>
    %4 = tpu.matmul %1, %2, %cst {dimension_numbers = #tpu.dot_dimension_numbers<[1], [0], [0], [1], [0, 0, 1, 1], [], []>} : vector<16x32xf32>, vector<32x32xf32>, vector<16x32xf32> -> vector<16x32xf32>
    %5 = arith.addf %4, %3 : vector<16x32xf32>
    %c48 = arith.constant 48 : index
    %c0_5 = arith.constant 0 : index
    %6 = vector.load %arg4[%c48, %c0_5] : memref<272x32xf32, #tpu.memory_space<vmem>>, vector<16x32xf32>
    %c64 = arith.constant 64 : index
    %c0_6 = arith.constant 0 : index
    %7 = vector.load %arg4[%c64, %c0_6] : memref<272x32xf32, #tpu.memory_space<vmem>>, vector<16x32xf32>
    %c80 = arith.constant 80 : index
    %c0_7 = arith.constant 0 : index
    %8 = vector.load %arg4[%c80, %c0_7] : memref<272x32xf32, #tpu.memory_space<vmem>>, vector<16x32xf32>
    %c96 = arith.constant 96 : index
    %c0_8 = arith.constant 0 : index
    %9 = vector.load %arg4[%c96, %c0_8] : memref<272x32xf32, #tpu.memory_space<vmem>>, vector<16x32xf32>
    %c112 = arith.constant 112 : index
    %c0_9 = arith.constant 0 : index
    %10 = vector.load %arg4[%c112, %c0_9] : memref<272x32xf32, #tpu.memory_space<vmem>>, vector<16x32xf32>
    %c128 = arith.constant 128 : index
    %c0_10 = arith.constant 0 : index
    %11 = vector.load %arg4[%c128, %c0_10] : memref<272x32xf32, #tpu.memory_space<vmem>>, vector<16x32xf32>
    %c144 = arith.constant 144 : index
    %c0_11 = arith.constant 0 : index
    %12 = vector.load %arg4[%c144, %c0_11] : memref<272x32xf32, #tpu.memory_space<vmem>>, vector<16x32xf32>
    %13 = tpu.concatenate %5, %5 in 0 : vector<16x32xf32>, vector<16x32xf32> -> vector<32x32xf32>
    %c0_12 = arith.constant 0 : index
    %c0_13 = arith.constant 0 : index
    %c0_14 = arith.constant 0 : index
    %14 = vector.load %arg2[%c0_12, %c0_13, %c0_14] : memref<2x32x32xf32, #tpu.memory_space<vmem>>, vector<1x32x32xf32>
    %15 = vector.shape_cast %14 : vector<1x32x32xf32> to vector<32x32xf32>
    %cst_15 = arith.constant dense<0.000000e+00> : vector<32x32xf32>
    %16 = tpu.matmul %15, %13, %cst_15 {dimension_numbers = #tpu.dot_dimension_numbers<[1], [0], [0], [1], [0, 0, 1, 1], [], []>} : vector<32x32xf32>, vector<32x32xf32>, vector<32x32xf32> -> vector<32x32xf32>
    %17 = vector.extract_strided_slice %16 {offsets = [0, 0], sizes = [16, 32], strides = [1, 1]} : vector<32x32xf32> to vector<16x32xf32>
    %18 = arith.addf %17, %6 : vector<16x32xf32>
    %19 = vector.extract_strided_slice %16 {offsets = [16, 0], sizes = [16, 32], strides = [1, 1]} : vector<32x32xf32> to vector<16x32xf32>
    %20 = vector.shape_cast %18 : vector<16x32xf32> to vector<2x8x32xf32>
    %cst_16 = arith.constant dense<0.000000e+00> : vector<2x32xf32>
    %21 = vector.multi_reduction <add>, %20, %cst_16 [1] : vector<2x8x32xf32> to vector<2x32xf32>
    %22 = vector.shape_cast %21 : vector<2x32xf32> to vector<2x1x32xf32>
    %cst_17 = arith.constant 8.000000e+00 : f32
    %23 = vector.broadcast %cst_17 : f32 to vector<2x1x32xf32>
    %24 = arith.divf %22, %23 : vector<2x1x32xf32>
    %25 = arith.mulf %20, %20 : vector<2x8x32xf32>
    %cst_18 = arith.constant dense<0.000000e+00> : vector<2x32xf32>
    %26 = vector.multi_reduction <add>, %25, %cst_18 [1] : vector<2x8x32xf32> to vector<2x32xf32>
    %27 = vector.shape_cast %26 : vector<2x32xf32> to vector<2x1x32xf32>
    %cst_19 = arith.constant 8.000000e+00 : f32
    %28 = vector.broadcast %cst_19 : f32 to vector<2x1x32xf32>
    %29 = arith.divf %27, %28 : vector<2x1x32xf32>
    %30 = arith.mulf %24, %24 : vector<2x1x32xf32>
    %31 = arith.subf %29, %30 : vector<2x1x32xf32>
    %cst_20 = arith.constant 9.99999974E-6 : f32
    %32 = vector.broadcast %cst_20 : f32 to vector<2x1x32xf32>
    %33 = arith.addf %31, %32 : vector<2x1x32xf32>
    %34 = math.rsqrt %33 : vector<2x1x32xf32>
    %35 = vector.broadcast %24 : vector<2x1x32xf32> to vector<2x8x32xf32>
    %36 = arith.subf %20, %35 : vector<2x8x32xf32>
    %37 = vector.broadcast %34 : vector<2x1x32xf32> to vector<2x8x32xf32>
    %38 = arith.mulf %36, %37 : vector<2x8x32xf32>
    %39 = vector.shape_cast %38 : vector<2x8x32xf32> to vector<16x32xf32>
    %40 = arith.mulf %39, %7 : vector<16x32xf32>
    %41 = arith.addf %40, %8 : vector<16x32xf32>
    %c0_21 = arith.constant 0 : index
    %c0_22 = arith.constant 0 : index
    %c0_23 = arith.constant 0 : index
    %42 = vector.load %arg3[%c0_21, %c0_22, %c0_23] : memref<2x16x16xf32, #tpu.memory_space<vmem>>, vector<1x16x16xf32>
    %43 = vector.shape_cast %42 : vector<1x16x16xf32> to vector<16x16xf32>
    %44 = arith.addf %5, %41 : vector<16x32xf32>
    %cst_24 = arith.constant dense<0.000000e+00> : vector<16x32xf32>
    %45 = tpu.matmul %43, %44, %cst_24 {dimension_numbers = #tpu.dot_dimension_numbers<[1], [0], [0], [1], [0, 0, 1, 1], [], []>} : vector<16x16xf32>, vector<16x32xf32>, vector<16x32xf32> -> vector<16x32xf32>
    %cst_25 = arith.constant dense<0.000000e+00> : vector<16xf32>
    %46 = vector.multi_reduction <add>, %45, %cst_25 [1] : vector<16x32xf32> to vector<16xf32>
    %47 = vector.shape_cast %46 : vector<16xf32> to vector<16x1xf32>
    %cst_26 = arith.constant 3.200000e+01 : f32
    %48 = vector.broadcast %cst_26 : f32 to vector<16x1xf32>
    %49 = arith.divf %47, %48 : vector<16x1xf32>
    %50 = arith.mulf %45, %45 : vector<16x32xf32>
    %cst_27 = arith.constant dense<0.000000e+00> : vector<16xf32>
    %51 = vector.multi_reduction <add>, %50, %cst_27 [1] : vector<16x32xf32> to vector<16xf32>
    %52 = vector.shape_cast %51 : vector<16xf32> to vector<16x1xf32>
    %cst_28 = arith.constant 3.200000e+01 : f32
    %53 = vector.broadcast %cst_28 : f32 to vector<16x1xf32>
    %54 = arith.divf %52, %53 : vector<16x1xf32>
    %55 = arith.mulf %49, %49 : vector<16x1xf32>
    %56 = arith.subf %54, %55 : vector<16x1xf32>
    %cst_29 = arith.constant 9.99999974E-6 : f32
    %57 = vector.broadcast %cst_29 : f32 to vector<16x1xf32>
    %58 = arith.addf %56, %57 : vector<16x1xf32>
    %59 = math.rsqrt %58 : vector<16x1xf32>
    %60 = vector.broadcast %49 : vector<16x1xf32> to vector<16x32xf32>
    %61 = arith.subf %45, %60 : vector<16x32xf32>
    %62 = vector.broadcast %59 : vector<16x1xf32> to vector<16x32xf32>
    %63 = arith.mulf %61, %62 : vector<16x32xf32>
    %64 = arith.mulf %63, %9 : vector<16x32xf32>
    %65 = arith.addf %64, %10 : vector<16x32xf32>
    %66 = arith.addf %5, %65 : vector<16x32xf32>
    %cst_30 = arith.constant dense<0.000000e+00> : vector<16xf32>
    %67 = vector.multi_reduction <add>, %19, %cst_30 [1] : vector<16x32xf32> to vector<16xf32>
    %68 = vector.shape_cast %67 : vector<16xf32> to vector<16x1xf32>
    %cst_31 = arith.constant 3.200000e+01 : f32
    %69 = vector.broadcast %cst_31 : f32 to vector<16x1xf32>
    %70 = arith.divf %68, %69 : vector<16x1xf32>
    %71 = arith.mulf %19, %19 : vector<16x32xf32>
    %cst_32 = arith.constant dense<0.000000e+00> : vector<16xf32>
    %72 = vector.multi_reduction <add>, %71, %cst_32 [1] : vector<16x32xf32> to vector<16xf32>
    %73 = vector.shape_cast %72 : vector<16xf32> to vector<16x1xf32>
    %cst_33 = arith.constant 3.200000e+01 : f32
    %74 = vector.broadcast %cst_33 : f32 to vector<16x1xf32>
    %75 = arith.divf %73, %74 : vector<16x1xf32>
    %76 = arith.mulf %70, %70 : vector<16x1xf32>
    %77 = arith.subf %75, %76 : vector<16x1xf32>
    %cst_34 = arith.constant 9.99999974E-6 : f32
    %78 = vector.broadcast %cst_34 : f32 to vector<16x1xf32>
    %79 = arith.addf %77, %78 : vector<16x1xf32>
    %80 = math.rsqrt %79 : vector<16x1xf32>
    %81 = vector.broadcast %70 : vector<16x1xf32> to vector<16x32xf32>
    %82 = arith.subf %19, %81 : vector<16x32xf32>
    %83 = vector.broadcast %80 : vector<16x1xf32> to vector<16x32xf32>
    %84 = arith.mulf %82, %83 : vector<16x32xf32>
    %85 = arith.mulf %84, %11 : vector<16x32xf32>
    %86 = arith.addf %85, %12 : vector<16x32xf32>
    %87 = arith.addf %5, %86 : vector<16x32xf32>
    %c160 = arith.constant 160 : index
    %c0_35 = arith.constant 0 : index
    %88 = vector.load %arg4[%c160, %c0_35] : memref<272x32xf32, #tpu.memory_space<vmem>>, vector<16x32xf32>
    %c176 = arith.constant 176 : index
    %c0_36 = arith.constant 0 : index
    %89 = vector.load %arg4[%c176, %c0_36] : memref<272x32xf32, #tpu.memory_space<vmem>>, vector<16x32xf32>
    %c192 = arith.constant 192 : index
    %c0_37 = arith.constant 0 : index
    %90 = vector.load %arg4[%c192, %c0_37] : memref<272x32xf32, #tpu.memory_space<vmem>>, vector<16x32xf32>
    %c208 = arith.constant 208 : index
    %c0_38 = arith.constant 0 : index
    %91 = vector.load %arg4[%c208, %c0_38] : memref<272x32xf32, #tpu.memory_space<vmem>>, vector<16x32xf32>
    %c224 = arith.constant 224 : index
    %c0_39 = arith.constant 0 : index
    %92 = vector.load %arg4[%c224, %c0_39] : memref<272x32xf32, #tpu.memory_space<vmem>>, vector<16x32xf32>
    %c240 = arith.constant 240 : index
    %c0_40 = arith.constant 0 : index
    %93 = vector.load %arg4[%c240, %c0_40] : memref<272x32xf32, #tpu.memory_space<vmem>>, vector<16x32xf32>
    %c256 = arith.constant 256 : index
    %c0_41 = arith.constant 0 : index
    %94 = vector.load %arg4[%c256, %c0_41] : memref<272x32xf32, #tpu.memory_space<vmem>>, vector<16x32xf32>
    %95 = tpu.concatenate %66, %87 in 0 : vector<16x32xf32>, vector<16x32xf32> -> vector<32x32xf32>
    %c1 = arith.constant 1 : index
    %c0_42 = arith.constant 0 : index
    %c0_43 = arith.constant 0 : index
    %96 = vector.load %arg2[%c1, %c0_42, %c0_43] : memref<2x32x32xf32, #tpu.memory_space<vmem>>, vector<1x32x32xf32>
    %97 = vector.shape_cast %96 : vector<1x32x32xf32> to vector<32x32xf32>
    %cst_44 = arith.constant dense<0.000000e+00> : vector<32x32xf32>
    %98 = tpu.matmul %97, %95, %cst_44 {dimension_numbers = #tpu.dot_dimension_numbers<[1], [0], [0], [1], [0, 0, 1, 1], [], []>} : vector<32x32xf32>, vector<32x32xf32>, vector<32x32xf32> -> vector<32x32xf32>
    %99 = vector.extract_strided_slice %98 {offsets = [0, 0], sizes = [16, 32], strides = [1, 1]} : vector<32x32xf32> to vector<16x32xf32>
    %100 = arith.addf %99, %88 : vector<16x32xf32>
    %101 = vector.extract_strided_slice %98 {offsets = [16, 0], sizes = [16, 32], strides = [1, 1]} : vector<32x32xf32> to vector<16x32xf32>
    %102 = vector.shape_cast %100 : vector<16x32xf32> to vector<2x8x32xf32>
    %cst_45 = arith.constant dense<0.000000e+00> : vector<2x32xf32>
    %103 = vector.multi_reduction <add>, %102, %cst_45 [1] : vector<2x8x32xf32> to vector<2x32xf32>
    %104 = vector.shape_cast %103 : vector<2x32xf32> to vector<2x1x32xf32>
    %cst_46 = arith.constant 8.000000e+00 : f32
    %105 = vector.broadcast %cst_46 : f32 to vector<2x1x32xf32>
    %106 = arith.divf %104, %105 : vector<2x1x32xf32>
    %107 = arith.mulf %102, %102 : vector<2x8x32xf32>
    %cst_47 = arith.constant dense<0.000000e+00> : vector<2x32xf32>
    %108 = vector.multi_reduction <add>, %107, %cst_47 [1] : vector<2x8x32xf32> to vector<2x32xf32>
    %109 = vector.shape_cast %108 : vector<2x32xf32> to vector<2x1x32xf32>
    %cst_48 = arith.constant 8.000000e+00 : f32
    %110 = vector.broadcast %cst_48 : f32 to vector<2x1x32xf32>
    %111 = arith.divf %109, %110 : vector<2x1x32xf32>
    %112 = arith.mulf %106, %106 : vector<2x1x32xf32>
    %113 = arith.subf %111, %112 : vector<2x1x32xf32>
    %cst_49 = arith.constant 9.99999974E-6 : f32
    %114 = vector.broadcast %cst_49 : f32 to vector<2x1x32xf32>
    %115 = arith.addf %113, %114 : vector<2x1x32xf32>
    %116 = math.rsqrt %115 : vector<2x1x32xf32>
    %117 = vector.broadcast %106 : vector<2x1x32xf32> to vector<2x8x32xf32>
    %118 = arith.subf %102, %117 : vector<2x8x32xf32>
    %119 = vector.broadcast %116 : vector<2x1x32xf32> to vector<2x8x32xf32>
    %120 = arith.mulf %118, %119 : vector<2x8x32xf32>
    %121 = vector.shape_cast %120 : vector<2x8x32xf32> to vector<16x32xf32>
    %122 = arith.mulf %121, %89 : vector<16x32xf32>
    %123 = arith.addf %122, %90 : vector<16x32xf32>
    %c1_50 = arith.constant 1 : index
    %c0_51 = arith.constant 0 : index
    %c0_52 = arith.constant 0 : index
    %124 = vector.load %arg3[%c1_50, %c0_51, %c0_52] : memref<2x16x16xf32, #tpu.memory_space<vmem>>, vector<1x16x16xf32>
    %125 = vector.shape_cast %124 : vector<1x16x16xf32> to vector<16x16xf32>
    %126 = arith.addf %66, %123 : vector<16x32xf32>
    %cst_53 = arith.constant dense<0.000000e+00> : vector<16x32xf32>
    %127 = tpu.matmul %125, %126, %cst_53 {dimension_numbers = #tpu.dot_dimension_numbers<[1], [0], [0], [1], [0, 0, 1, 1], [], []>} : vector<16x16xf32>, vector<16x32xf32>, vector<16x32xf32> -> vector<16x32xf32>
    %cst_54 = arith.constant dense<0.000000e+00> : vector<16xf32>
    %128 = vector.multi_reduction <add>, %127, %cst_54 [1] : vector<16x32xf32> to vector<16xf32>
    %129 = vector.shape_cast %128 : vector<16xf32> to vector<16x1xf32>
    %cst_55 = arith.constant 3.200000e+01 : f32
    %130 = vector.broadcast %cst_55 : f32 to vector<16x1xf32>
    %131 = arith.divf %129, %130 : vector<16x1xf32>
    %132 = arith.mulf %127, %127 : vector<16x32xf32>
    %cst_56 = arith.constant dense<0.000000e+00> : vector<16xf32>
    %133 = vector.multi_reduction <add>, %132, %cst_56 [1] : vector<16x32xf32> to vector<16xf32>
    %134 = vector.shape_cast %133 : vector<16xf32> to vector<16x1xf32>
    %cst_57 = arith.constant 3.200000e+01 : f32
    %135 = vector.broadcast %cst_57 : f32 to vector<16x1xf32>
    %136 = arith.divf %134, %135 : vector<16x1xf32>
    %137 = arith.mulf %131, %131 : vector<16x1xf32>
    %138 = arith.subf %136, %137 : vector<16x1xf32>
    %cst_58 = arith.constant 9.99999974E-6 : f32
    %139 = vector.broadcast %cst_58 : f32 to vector<16x1xf32>
    %140 = arith.addf %138, %139 : vector<16x1xf32>
    %141 = math.rsqrt %140 : vector<16x1xf32>
    %142 = vector.broadcast %131 : vector<16x1xf32> to vector<16x32xf32>
    %143 = arith.subf %127, %142 : vector<16x32xf32>
    %144 = vector.broadcast %141 : vector<16x1xf32> to vector<16x32xf32>
    %145 = arith.mulf %143, %144 : vector<16x32xf32>
    %146 = arith.mulf %145, %91 : vector<16x32xf32>
    %147 = arith.addf %146, %92 : vector<16x32xf32>
    %148 = arith.addf %66, %147 : vector<16x32xf32>
    %cst_59 = arith.constant dense<0.000000e+00> : vector<16xf32>
    %149 = vector.multi_reduction <add>, %101, %cst_59 [1] : vector<16x32xf32> to vector<16xf32>
    %150 = vector.shape_cast %149 : vector<16xf32> to vector<16x1xf32>
    %cst_60 = arith.constant 3.200000e+01 : f32
    %151 = vector.broadcast %cst_60 : f32 to vector<16x1xf32>
    %152 = arith.divf %150, %151 : vector<16x1xf32>
    %153 = arith.mulf %101, %101 : vector<16x32xf32>
    %cst_61 = arith.constant dense<0.000000e+00> : vector<16xf32>
    %154 = vector.multi_reduction <add>, %153, %cst_61 [1] : vector<16x32xf32> to vector<16xf32>
    %155 = vector.shape_cast %154 : vector<16xf32> to vector<16x1xf32>
    %cst_62 = arith.constant 3.200000e+01 : f32
    %156 = vector.broadcast %cst_62 : f32 to vector<16x1xf32>
    %157 = arith.divf %155, %156 : vector<16x1xf32>
    %158 = arith.mulf %152, %152 : vector<16x1xf32>
    %159 = arith.subf %157, %158 : vector<16x1xf32>
    %cst_63 = arith.constant 9.99999974E-6 : f32
    %160 = vector.broadcast %cst_63 : f32 to vector<16x1xf32>
    %161 = arith.addf %159, %160 : vector<16x1xf32>
    %162 = math.rsqrt %161 : vector<16x1xf32>
    %163 = vector.broadcast %152 : vector<16x1xf32> to vector<16x32xf32>
    %164 = arith.subf %101, %163 : vector<16x32xf32>
    %165 = vector.broadcast %162 : vector<16x1xf32> to vector<16x32xf32>
    %166 = arith.mulf %164, %165 : vector<16x32xf32>
    %167 = arith.mulf %166, %93 : vector<16x32xf32>
    %168 = arith.addf %167, %94 : vector<16x32xf32>
    %169 = arith.addf %87, %168 : vector<16x32xf32>
    %170 = tpu.concatenate %148, %169 in 1 : vector<16x32xf32>, vector<16x32xf32> -> vector<16x64xf32>
    %c0_64 = arith.constant 0 : index
    %c0_65 = arith.constant 0 : index
    %171 = vector.load %arg5[%c0_64, %c0_65] : memref<80x64xf32, #tpu.memory_space<vmem>>, vector<64x64xf32>
    %cst_66 = arith.constant dense<0.000000e+00> : vector<16x64xf32>
    %172 = tpu.matmul %170, %171, %cst_66 {dimension_numbers = #tpu.dot_dimension_numbers<[1], [0], [0], [1], [0, 0, 1, 1], [], []>} : vector<16x64xf32>, vector<64x64xf32>, vector<16x64xf32> -> vector<16x64xf32>
    %c64_67 = arith.constant 64 : index
    %c0_68 = arith.constant 0 : index
    %173 = vector.load %arg5[%c64_67, %c0_68] : memref<80x64xf32, #tpu.memory_space<vmem>>, vector<16x64xf32>
    %174 = arith.addf %172, %173 : vector<16x64xf32>
    %175 = vector.shape_cast %174 : vector<16x64xf32> to vector<2x8x64xf32>
    %c0_69 = arith.constant 0 : index
    %c0_70 = arith.constant 0 : index
    %c0_71 = arith.constant 0 : index
    %176 = vector.load %arg6[%c0_69, %c0_70, %c0_71] : memref<2x8x64xf32, #tpu.memory_space<vmem>>, vector<2x8x64xf32>
    tpu.vector_store %arg6[%c0_69, %c0_70, %c0_71], %175 {strides = array<i32>} : memref<2x8x64xf32, #tpu.memory_space<vmem>>, vector<2x8x64xf32>,
    return
  }
  func.func @transform_0(%arg0: i32) -> (i32, i32, i32) {
    %c0_i32 = arith.constant 0 : i32
    %c0_i32_0 = arith.constant 0 : i32
    %c0_i32_1 = arith.constant 0 : i32
    return %arg0, %c0_i32, %c0_i32_0 : i32, i32, i32
  }
  func.func @transform_1(%arg0: i32) -> (i32, i32, i32) {
    %c0_i32 = arith.constant 0 : i32
    %c0_i32_0 = arith.constant 0 : i32
    %c0_i32_1 = arith.constant 0 : i32
    %c0_i32_2 = arith.constant 0 : i32
    return %c0_i32, %c0_i32_0, %c0_i32_1 : i32, i32, i32
  }
  func.func @transform_2(%arg0: i32) -> (i32, i32, i32) {
    %c0_i32 = arith.constant 0 : i32
    %c0_i32_0 = arith.constant 0 : i32
    %c0_i32_1 = arith.constant 0 : i32
    %c0_i32_2 = arith.constant 0 : i32
    return %c0_i32, %c0_i32_0, %c0_i32_1 : i32, i32, i32
  }
  func.func @transform_3(%arg0: i32) -> (i32, i32) {
    %c0_i32 = arith.constant 0 : i32
    %c0_i32_0 = arith.constant 0 : i32
    %c0_i32_1 = arith.constant 0 : i32
    return %c0_i32, %c0_i32_0 : i32, i32
  }
  func.func @transform_4(%arg0: i32) -> (i32, i32) {
    %c0_i32 = arith.constant 0 : i32
    %c0_i32_0 = arith.constant 0 : i32
    %c0_i32_1 = arith.constant 0 : i32
    return %c0_i32, %c0_i32_0 : i32, i32
  }
  func.func @transform_5(%arg0: i32) -> (i32, i32, i32) {
    %c0_i32 = arith.constant 0 : i32
    %c0_i32_0 = arith.constant 0 : i32
    %c0_i32_1 = arith.constant 0 : i32
    return %arg0, %c0_i32, %c0_i32_0 : i32, i32, i32
  }
}

</mosaic_0001>

<bundles_post_ra>
// kernel: tpu_custom_call.1
= control target key start
LH: loop header
LB: loop body
LE: loop exit
PB: predicated region body
PF: predicated region fallthrough
CT: control target
= control target key end

     0   :  { %vm29_vm0 = vcmask 261120   ;;  %s1466_s0 = inlined_call_operand.vmem [shape: f32[2,8,32], index: 0, kind: input, shape index: {}]   ;;  %s1467_s1 = inlined_call_operand.vmem [shape: f32[2,32,32], index: 1, kind: input, shape index: {}]   ;;  %s1468_s2 = inlined_call_operand.vmem [shape: f32[2,16,16], index: 2, kind: input, shape index: {}]   ;;  %s1469_s3 = inlined_call_operand.vmem [shape: f32[272,32], index: 3, kind: input, shape index: {}]   ;;  %s1470_s4 = inlined_call_operand.vmem [shape: f32[80,64], index: 4, kind: input, shape index: {}]   ;;  %s1471_s5 = inlined_call_operand.hbm [shape: f32[2,8,64], index: 5, kind: output, shape index: {}]  }
   0x1   :  { %v23_v0 = vld [vmem:[%s1469_s3] sm:$0xff]  ;;  %v24_v1 = vld [vmem:[%s1469_s3 + $0x8] sm:$0xff]  ;;  %v25_v2 = vld [vmem:[%s1469_s3 + $0x10] sm:$0xff] }
   0x2   :  { %v1018_v3 = vpack.c.bf16 %v24_v1, %v23_v0  ;;  %v26_v4 = vld [vmem:[%s1469_s3 + $0x18] sm:$0xff]  ;;  %v21_v5 = vld [vmem:[%s1466_s0] sm:$0xff] }
   0x3   :  { %v1022_v6 = vpack.c.bf16 %v26_v4, %v25_v2  ;;  %954 = vmatprep.mubr.msk.f32.mxu1 %vm29_vm0, %v21_v5 }
   0x4   :  { %10 = vsyncpa [#allocation3], 0  ;;  %1019 = vmatprep.subr.bf16.mxu1 %v1018_v3  ;;  %v22_v7 = vld [vmem:[%s1466_s0 + $0x8] sm:$0xff]  ;;  %v125_v8 = vld [vmem:[%s1467_s1] sm:$0xff]  ;;  %vm283_vm1 = vcmask 130048   ;;  %s1118_s26 = smov 32  }
   0x5   :  { %1021 = vmatpush3.bf16.msra.mxu1 %v1018_v3  ;;  %v28_v9 = vld [vmem:[%s1469_s3 + $0x28] sm:$0xff]  ;;  %v27_v10 = vld [vmem:[%s1469_s3 + $0x20] sm:$0xff]  ;;  %v127_v17 = vld [vmem:[%s1467_s1 + $0x10] sm:$0xff]  ;;  %vm784_vm2 = vcmask 523264  }
   0x6   :  { %1023 = vmatprep.subr.bf16.mxu1 %v1022_v6  ;;  %v126_v16 = vld [vmem:[%s1467_s1 + $0x8] sm:$0xff]  ;;  %v128_v18 = vld [vmem:[%s1467_s1 + $0x18] sm:$0xff]  ;;  %v279_v19 = vld [vmem:[%s1468_s2] sm:$0xff] }
   0x7   :  { %975 = vmatprep.mubr.msk.f32.mxu0 %vm283_vm1, %v279_v19  ;;  %v112_v20 = vld [vmem:[%s1469_s3 + $0x38] sm:$0xff]  ;;  %v111_v21 = vld [vmem:[%s1469_s3 + $0x30] sm:$0xff] }
   0x9   :  { %1025 = vmatpush3.bf16.msra.mxu1 %v1022_v6 }
   0xc   :  { %955 = vmatmul.mubr.msk.f32.vlgmr.msra.gmra.mrb[0].mxu1 %vm29_vm0, %v22_v7 }
   0xd   :  { %965 = vmatprep.mubr.msk.f32.mxu1 %vm29_vm0, %v125_v8  ;;  %v114_v8 = vld [vmem:[%s1469_s3 + $0x48] sm:$0xff] }
  0xdf   :  { %v956_v11 = vpop.f32.mrb[0].mxu1 }
  0xe0   :  { %v1182_v12 = vadd.f32 %v956_v11, %v28_v9  ;;  %v102_v13 = vpop.f32.mrb[1].mxu1  ;;  %v113_v11 = vld [vmem:[%s1469_s3 + $0x40] sm:$0xff] }
  0xe1   :  { %v1184_v14 = vadd.f32 %v102_v13, %v27_v10 }
  0xe3   :  { %v1026_v15 = vpack.c.bf16 %v1182_v12, %v1184_v14 }
  0xe5   :  { %1027 = vmatprep.subr.bf16.mxu1 %v1026_v15 }
  0xe6   :  { %1029 = vmatpush3.bf16.msra.mxu1 %v1026_v15 }
  0xe7   :  { %1031 = vmatprep.subr.bf16.mxu1 %v1026_v15 }
  0xea   :  { %1033 = vmatpush3.bf16.msra.mxu1 %v1026_v15  ;;  %v116_v15 = vld [vmem:[%s1469_s3 + $0x58] sm:$0xff] }
  0xed   :  { %966 = vmatmul.mubr.msk.f32.vlgmr.msra.gmra.mrb[2].mxu1 %vm29_vm0, %v126_v16  ;;  %v115_v16 = vld [vmem:[%s1469_s3 + $0x50] sm:$0xff] }
  0xee   :  { %968 = vmatprep.mubr.msk.f32.mxu1 %vm29_vm0, %v127_v17 }
  0xf1   :  { %969 = vmatmul.mubr.msk.f32.gmra.mrb[4].mxu1 %vm29_vm0, %v128_v18 }
 0x1c0   :  { %v967_v22 = vpop.f32.mrb[2].mxu1 }
 0x1c1   :  { %v227_v23 = vadd.f32 %v967_v22, %v112_v20  ;;  %v207_v24 = vpop.f32.mrb[3].mxu1 }
 0x1c2   :  { %v226_v25 = vadd.f32 %v207_v24, %v111_v21  ;;  %v280_v24 = vld [vmem:[%s1468_s2 + $0x8] sm:$0xff] }
 0x1c3   :  { %v235_v26 = vsel %vm29_vm0, %v227_v23, 0.0  ;;  %v246_v27 = vmul.f32 %v227_v23, %v227_v23 }
 0x1c4   :  { %v236_v28 = vrot.slane %v235_v26, 4  ;;  %v228_v29 = vsel %vm29_vm0, %v226_v25, 0.0  ;;  %v245_v30 = vmul.f32 %v226_v25, %v226_v25  ;;  %v1212_v31 = vpop.f32.mrb[4].mxu1 }
 0x1c5   :  { %v254_v32 = vsel %vm29_vm0, %v246_v27, 0.0  ;;  %v229_v33 = vrot.slane %v228_v29, 4  ;;  %v405_v34 = vsel %vm29_vm0, %v1212_v31, 0.0  ;;  %v1218_v3 = vpop.f32.mrb[5].mxu1 }
 0x1c6   :  { %v237_v35 = vadd.f32 %v236_v28, %v235_v26  ;;  %v255_v36 = vrot.slane %v254_v32, 4  ;;  %v247_v37 = vsel %vm29_vm0, %v245_v30, 0.0  ;;  %406 = vadd.xlane.f32.xlu1 %v405_v34  ;;  %v411_v34 = vmul.f32 %v1212_v31, %v1212_v31 }
 0x1c7   :  { %v230_v38 = vadd.f32 %v229_v33, %v228_v29  ;;  %v248_v39 = vrot.slane %v247_v37, 4 }
 0x1c8   :  { %v238_v40 = vrot.slane %v237_v35, 2  ;;  %v256_v41 = vadd.f32 %v255_v36, %v254_v32  ;;  %v410_v36 = vmul.f32 %v1218_v3, %v1218_v3 }
 0x1c9   :  { %v231_v42 = vrot.slane %v230_v38, 2  ;;  %v249_v43 = vadd.f32 %v248_v39, %v247_v37  ;;  %v415_v37 = vsel %vm29_vm0, %v411_v34, 0.0  ;;  %v892_v39 = vld [vmem:[%s1467_s1 + $0x20] sm:$0xff] }
 0x1ca   :  { %v239_v44 = vadd.f32 %v238_v40, %v237_v35  ;;  %v257_v45 = vrot.slane %v256_v41, 2  ;;  %v402_v35 = vsel %vm29_vm0, %v1218_v3, 0.0  ;;  %986 = vmatprep.mubr.msk.f32.mxu1 %vm29_vm0, %v892_v39 }
 0x1cb   :  { %v232_v46 = vadd.f32 %v231_v42, %v230_v38  ;;  %v250_v47 = vrot.slane %v249_v43, 2  ;;  %v412_v38 = vsel %vm29_vm0, %v410_v36, 0.0 }
 0x1cc   :  { %v240_v48 = vrot.slane %v239_v44, 1  ;;  %v258_v49 = vadd.f32 %v257_v45, %v256_v41 }
 0x1cd   :  { %v233_v50 = vrot.slane %v232_v46, 1  ;;  %v251_v51 = vadd.f32 %v250_v47, %v249_v43 }
 0x1ce   :  { %v241_v52 = vadd.f32 %v240_v48, %v239_v44  ;;  %v259_v53 = vrot.slane %v258_v49, 1 }
 0x1cf   :  { %v234_v54 = vadd.f32 %v233_v50, %v232_v46  ;;  %v252_v55 = vrot.slane %v251_v51, 1 }
 0x1d0   :  { %v244_v56 = vmul.f32 0.125, %v241_v52  ;;  %v260_v57 = vadd.f32 %v259_v53, %v258_v49 }
 0x1d1   :  { %v243_v58 = vmul.f32 0.125, %v234_v54  ;;  %v253_v59 = vadd.f32 %v252_v55, %v251_v51 }
 0x1d2   :  { %v262_v60 = vmul.f32 0.125, %v260_v57  ;;  %v264_v61 = vmul.f32 %v244_v56, %v244_v56  ;;  %v272_v5 = vsub.f32 %v227_v23, %v244_v56 }
 0x1d3   :  { %v261_v62 = vmul.f32 0.125, %v253_v59  ;;  %v263_v63 = vmul.f32 %v243_v58, %v243_v58  ;;  %v271_v7 = vsub.f32 %v226_v25, %v243_v58 }
 0x1d4   :  { %v266_v0 = vsub.f32 %v262_v60, %v264_v61 }
 0x1d5   :  { %v265_v1 = vsub.f32 %v261_v62, %v263_v63 }
 0x1d6   :  { %v268_v2 = vadd.f32 1e-05, %v266_v0 }
 0x1d7   :  { %v267_v4 = vadd.f32 1e-05, %v265_v1 }
 0x1d8   :  { %1070 = vrsqrt.f32 %v268_v2 }
 0x1d9   :  { %1072 = vrsqrt.f32 %v267_v4 }
 0x1e2   :  { %v1071_v6 = vpop.eup %1070 }
 0x1e3   :  { %v1073_v9 = vpop.eup %1072  ;;  %v274_v10 = vmul.f32 %v1071_v6, %v272_v5 }
 0x1e4   :  { %v273_v13 = vmul.f32 %v1073_v9, %v271_v7  ;;  %v118_v7 = vld [vmem:[%s1469_s3 + $0x68] sm:$0xff] }
 0x1e5   :  { %v276_v17 = vmul.f32 %v274_v10, %v114_v8 }
 0x1e6   :  { %v275_v18 = vmul.f32 %v273_v13, %v113_v11  ;;  %v117_v13 = vld [vmem:[%s1469_s3 + $0x60] sm:$0xff] }
 0x1e7   :  { %v278_v19 = vadd.f32 %v276_v17, %v116_v15  ;;  %v120_v15 = vld [vmem:[%s1469_s3 + $0x78] sm:$0xff]  ;;  %v119_v17 = vld [vmem:[%s1469_s3 + $0x70] sm:$0xff] }
 0x1e8   :  { %v277_v20 = vadd.f32 %v275_v18, %v115_v16 }
 0x1e9   :  { %v282_v21 = vadd.f32 %v278_v19, %v1182_v12 }
 0x1ea   :  { %v281_v22 = vadd.f32 %v277_v20, %v1184_v14 }
 0x1ec   :  { %v1034_v23 = vpack.c.bf16 %v282_v21, %v281_v22  ;;  %v122_v22 = vld [vmem:[%s1469_s3 + $0x88] sm:$0xff] }
 0x1ee   :  { %1035 = vmatprep.subr.bf16.mxu0 %v1034_v23 }
 0x1ef   :  { %1037 = vmatpush3.bf16.msra.mxu0 %v1034_v23 }
 0x1f2   :  { %976 = vmatmul.mubr.msk.f32.vlgmr.msra.gmra.mrb[0].mxu0 %vm283_vm1, %v280_v24 }
 0x253   :  { %v407_v40 = vpop.xlane.xlu1 %406 }
 0x254   :  { %v409_v54 = vmul.f32 0.03125, %v407_v40  ;;  %v893_v40 = vld [vmem:[%s1467_s1 + $0x28] sm:$0xff] }
 0x256   :  { %v421_v58 = vmul.f32 %v409_v54, %v409_v54  ;;  %v429_v18 = vsub.f32 %v1212_v31, %v409_v54  ;;  %v124_v31 = vld [vmem:[%s1469_s3 + $0x98] sm:$0xff] }
 0x2c5   :  { %v977_v25 = vpop.f32.mrb[0].mxu0 }
 0x2c6   :  { %v1238_v26 = vpop.f32.mrb[1].mxu0  ;;  %v368_v27 = vsel %vm29_vm0, %v977_v25, 0.0  ;;  %v375_v28 = vmul.f32 %v977_v25, %v977_v25 }
 0x2c7   :  { %369 = vadd.xlane.f32.xlu0 %v368_v27  ;;  %v374_v30 = vmul.f32 %v1238_v26, %v1238_v26  ;;  %v365_v32 = vsel %vm29_vm0, %v1238_v26, 0.0  ;;  %v121_v27 = vld [vmem:[%s1469_s3 + $0x80] sm:$0xff] }
 0x2c8   :  { %v379_v29 = vsel %vm29_vm0, %v375_v28, 0.0 }
 0x2c9   :  { %380 = vadd.xlane.f32.xlu1 %v379_v29  ;;  %v376_v33 = vsel %vm29_vm0, %v374_v30, 0.0 }
 0x2cb   :  { %366 = vadd.xlane.f32.xlu0 %v365_v32 }
 0x2cd   :  { %377 = vadd.xlane.f32.xlu1 %v376_v33 }
 0x2cf   :  { %403 = vadd.xlane.f32.xlu0 %v402_v35 }
 0x2d1   :  { %416 = vadd.xlane.f32.xlu1 %v415_v37 }
 0x2d3   :  { %413 = vadd.xlane.f32.xlu0 %v412_v38 }
 0x354   :  { %v370_v41 = vpop.xlane.xlu0 %369 }
 0x355   :  { %v373_v42 = vmul.f32 0.03125, %v370_v41  ;;  %v894_v41 = vld [vmem:[%s1467_s1 + $0x30] sm:$0xff] }
 0x356   :  { %v381_v43 = vpop.xlane.xlu1 %380 }
 0x357   :  { %v385_v44 = vmul.f32 %v373_v42, %v373_v42  ;;  %v383_v45 = vmul.f32 0.03125, %v381_v43  ;;  %v393_v5 = vsub.f32 %v977_v25, %v373_v42  ;;  %v439_v42 = vld [vmem:[%s1469_s3 + $0xa8] sm:$0xff]  ;;  %v438_v43 = vld [vmem:[%s1469_s3 + $0xa0] sm:$0xff] }
 0x358   :  { %v367_v46 = vpop.xlane.xlu0 %366 }
 0x359   :  { %v387_v47 = vsub.f32 %v383_v45, %v385_v44  ;;  %v372_v48 = vmul.f32 0.03125, %v367_v46 }
 0x35a   :  { %v378_v49 = vpop.xlane.xlu1 %377 }
 0x35b   :  { %v389_v50 = vadd.f32 1e-05, %v387_v47  ;;  %v384_v51 = vmul.f32 %v372_v48, %v372_v48  ;;  %v382_v52 = vmul.f32 0.03125, %v378_v49  ;;  %v392_v9 = vsub.f32 %v1238_v26, %v372_v48 }
 0x35c   :  { %v404_v53 = vpop.xlane.xlu0 %403 }
 0x35d   :  { %1074 = vrsqrt.f32 %v389_v50  ;;  %v386_v55 = vsub.f32 %v382_v52, %v384_v51  ;;  %v408_v56 = vmul.f32 0.03125, %v404_v53 }
 0x35e   :  { %v417_v57 = vpop.xlane.xlu1 %416 }
 0x35f   :  { %v388_v59 = vadd.f32 1e-05, %v386_v55  ;;  %v419_v60 = vmul.f32 0.03125, %v417_v57  ;;  %v420_v62 = vmul.f32 %v408_v56, %v408_v56  ;;  %v428_v23 = vsub.f32 %v1218_v3, %v408_v56  ;;  %v123_v3 = vld [vmem:[%s1469_s3 + $0x90] sm:$0xff] }
 0x360   :  { %v414_v61 = vpop.xlane.xlu0 %413 }
 0x361   :  { %1076 = vrsqrt.f32 %v388_v59  ;;  %v423_v63 = vsub.f32 %v419_v60, %v421_v58  ;;  %v418_v0 = vmul.f32 0.03125, %v414_v61 }
 0x363   :  { %v425_v1 = vadd.f32 1e-05, %v423_v63  ;;  %v422_v2 = vsub.f32 %v418_v0, %v420_v62 }
 0x365   :  { %1078 = vrsqrt.f32 %v425_v1  ;;  %v424_v4 = vadd.f32 1e-05, %v422_v2 }
 0x367   :  { %v1075_v6 = vpop.eup %1074  ;;  %1080 = vrsqrt.f32 %v424_v4 }
 0x368   :  { %v395_v8 = vmul.f32 %v1075_v6, %v393_v5 }
 0x36a   :  { %v397_v10 = vmul.f32 %v395_v8, %v118_v7 }
 0x36b   :  { %v1077_v11 = vpop.eup %1076 }
 0x36c   :  { %v394_v16 = vmul.f32 %v1077_v11, %v392_v9  ;;  %v399_v20 = vadd.f32 %v397_v10, %v120_v15 }
 0x36e   :  { %v396_v19 = vmul.f32 %v394_v16, %v117_v13  ;;  %v1287_v29 = vadd.f32 %v399_v20, %v1182_v12 }
 0x36f   :  { %v1079_v21 = vpop.eup %1078 }
 0x370   :  { %v398_v24 = vadd.f32 %v396_v19, %v119_v17  ;;  %v431_v25 = vmul.f32 %v1079_v21, %v429_v18 }
 0x371   :  { %v1081_v26 = vpop.eup %1080 }
 0x372   :  { %v1284_v28 = vadd.f32 %v398_v24, %v1184_v14  ;;  %v430_v30 = vmul.f32 %v1081_v26, %v428_v23  ;;  %v433_v32 = vmul.f32 %v431_v25, %v122_v22 }
 0x374   :  { %v1038_v33 = vpack.c.bf16 %v1287_v29, %v1284_v28  ;;  %v432_v34 = vmul.f32 %v430_v30, %v121_v27  ;;  %v435_v35 = vadd.f32 %v433_v32, %v124_v31 }
 0x376   :  { %1039 = vmatprep.subr.bf16.mxu1 %v1038_v33  ;;  %v434_v36 = vadd.f32 %v432_v34, %v123_v3  ;;  %v1298_v38 = vadd.f32 %v435_v35, %v1182_v12  ;;  %v895_v12 = vld [vmem:[%s1467_s1 + $0x38] sm:$0xff] }
 0x377   :  { %1041 = vmatpush3.bf16.msra.mxu1 %v1038_v33 }
 0x378   :  { %v1295_v37 = vadd.f32 %v434_v36, %v1184_v14  ;;  %v900_v14 = vld [vmem:[%s1468_s2 + $0x10] sm:$0xff] }
 0x379   :  { %996 = vmatprep.mubr.msk.f32.mxu0 %vm283_vm1, %v900_v14 }
 0x37a   :  { %v1042_v39 = vpack.c.bf16 %v1298_v38, %v1295_v37 }
 0x37c   :  { %1043 = vmatprep.subr.bf16.mxu1 %v1042_v39 }
 0x37d   :  { %1045 = vmatpush3.bf16.msra.mxu1 %v1042_v39 }
 0x380   :  { %987 = vmatmul.mubr.msk.f32.vlgmr.msra.gmra.mrb[6].mxu1 %vm29_vm0, %v893_v40  ;;  %v441_v40 = vld [vmem:[%s1469_s3 + $0xb8] sm:$0xff] }
 0x381   :  { %989 = vmatprep.mubr.msk.f32.mxu1 %vm29_vm0, %v894_v41 }
 0x384   :  { %990 = vmatmul.mubr.msk.f32.gmra.mrb[8].mxu1 %vm29_vm0, %v895_v12 }
 0x453   :  { %v988_v44 = vpop.f32.mrb[6].mxu1 }
 0x454   :  { %v1324_v45 = vadd.f32 %v988_v44, %v439_v42  ;;  %v535_v46 = vpop.f32.mrb[7].mxu1  ;;  %v440_v42 = vld [vmem:[%s1469_s3 + $0xb0] sm:$0xff]  ;;  %v443_v44 = vld [vmem:[%s1469_s3 + $0xc8] sm:$0xff] }
 0x455   :  { %v1326_v47 = vadd.f32 %v535_v46, %v438_v43 }
 0x456   :  { %v563_v48 = vsel %vm29_vm0, %v1324_v45, 0.0  ;;  %v573_v49 = vmul.f32 %v1324_v45, %v1324_v45 }
 0x457   :  { %v564_v50 = vrot.slane %v563_v48, 4  ;;  %v556_v51 = vsel %vm29_vm0, %v1326_v47, 0.0  ;;  %v572_v52 = vmul.f32 %v1326_v47, %v1326_v47  ;;  %v1336_v53 = vpop.f32.mrb[8].mxu1 }
 0x458   :  { %v581_v54 = vsel %vm29_vm0, %v573_v49, 0.0  ;;  %v557_v55 = vrot.slane %v556_v51, 4  ;;  %v1339_v56 = vpop.f32.mrb[9].mxu1  ;;  %v731_v57 = vsel %vm29_vm0, %v1336_v53, 0.0  ;;  %v737_v58 = vmul.f32 %v1336_v53, %v1336_v53 }
 0x459   :  { %v565_v59 = vadd.f32 %v564_v50, %v563_v48  ;;  %v582_v60 = vrot.slane %v581_v54, 4  ;;  %v574_v61 = vsel %vm29_vm0, %v572_v52, 0.0  ;;  %v736_v62 = vmul.f32 %v1339_v56, %v1339_v56  ;;  %732 = vadd.xlane.f32.xlu1 %v731_v57 }
 0x45a   :  { %v558_v63 = vadd.f32 %v557_v55, %v556_v51  ;;  %v575_v0 = vrot.slane %v574_v61, 4  ;;  %v728_v1 = vsel %vm29_vm0, %v1339_v56, 0.0  ;;  %v741_v2 = vsel %vm29_vm0, %v737_v58, 0.0 }
 0x45b   :  { %v566_v4 = vrot.slane %v565_v59, 2  ;;  %v583_v5 = vadd.f32 %v582_v60, %v581_v54  ;;  %729 = vadd.xlane.f32.xlu0 %v728_v1  ;;  %v738_v8 = vsel %vm29_vm0, %v736_v62, 0.0  ;;  %v901_v54 = vld [vmem:[%s1468_s2 + $0x18] sm:$0xff] }
 0x45c   :  { %v559_v6 = vrot.slane %v558_v63, 2  ;;  %v576_v7 = vadd.f32 %v575_v0, %v574_v61 }
 0x45d   :  { %v567_v9 = vadd.f32 %v566_v4, %v565_v59  ;;  %v584_v10 = vrot.slane %v583_v5, 2  ;;  %742 = vadd.xlane.f32.xlu1 %v741_v2 }
 0x45e   :  { %v560_v11 = vadd.f32 %v559_v6, %v558_v63  ;;  %v577_v13 = vrot.slane %v576_v7, 2 }
 0x45f   :  { %v568_v15 = vrot.slane %v567_v9, 1  ;;  %v585_v16 = vadd.f32 %v584_v10, %v583_v5  ;;  %739 = vadd.xlane.f32.xlu0 %v738_v8 }
 0x460   :  { %v561_v17 = vrot.slane %v560_v11, 1  ;;  %v578_v18 = vadd.f32 %v577_v13, %v576_v7 }
 0x461   :  { %v569_v19 = vadd.f32 %v568_v15, %v567_v9  ;;  %v586_v20 = vrot.slane %v585_v16, 1 }
 0x462   :  { %v562_v21 = vadd.f32 %v561_v17, %v560_v11  ;;  %v579_v22 = vrot.slane %v578_v18, 1 }
 0x463   :  { %v571_v23 = vmul.f32 0.125, %v569_v19  ;;  %v587_v24 = vadd.f32 %v586_v20, %v585_v16  ;;  %v449_v20 = vld [vmem:[%s1469_s3 + $0xf8] sm:$0xff] }
 0x464   :  { %v570_v25 = vmul.f32 0.125, %v562_v21  ;;  %v580_v26 = vadd.f32 %v579_v22, %v578_v18 }
 0x465   :  { %v589_v27 = vmul.f32 0.125, %v587_v24  ;;  %v591_v31 = vmul.f32 %v571_v23, %v571_v23  ;;  %v599_v36 = vsub.f32 %v1324_v45, %v571_v23  ;;  %v442_v45 = vld [vmem:[%s1469_s3 + $0xc0] sm:$0xff]  ;;  %v451_v24 = vld [vmem:[%s1469_s3 + $0x108] sm:$0xff] }
 0x466   :  { %v588_v30 = vmul.f32 0.125, %v580_v26  ;;  %v590_v32 = vmul.f32 %v570_v25, %v570_v25  ;;  %v598_v41 = vsub.f32 %v1326_v47, %v570_v25  ;;  %v448_v26 = vld [vmem:[%s1469_s3 + $0xf0] sm:$0xff] }
 0x467   :  { %v593_v3 = vsub.f32 %v589_v27, %v591_v31  ;;  %v450_v31 = vld [vmem:[%s1469_s3 + $0x100] sm:$0xff] }
 0x468   :  { %v592_v33 = vsub.f32 %v588_v30, %v590_v32 }
 0x469   :  { %v595_v34 = vadd.f32 1e-05, %v593_v3  ;;  %v774_v3 = vld [vmem:[%s1470_s4] sm:$0xff] }
 0x46a   :  { %v594_v35 = vadd.f32 1e-05, %v592_v33  ;;  %v775_v33 = vld [vmem:[%s1470_s4 + $0x8] sm:$0xff] }
 0x46b   :  { %1082 = vrsqrt.f32 %v595_v34  ;;  %v1050_v34 = vpack.c.bf16 %v775_v33, %v774_v3 }
 0x46c   :  { %1084 = vrsqrt.f32 %v594_v35 }
 0x475   :  { %v1083_v39 = vpop.eup %1082 }
 0x476   :  { %v1085_v12 = vpop.eup %1084  ;;  %v601_v14 = vmul.f32 %v1083_v39, %v599_v36  ;;  %v778_v36 = vld [vmem:[%s1470_s4 + $0x20] sm:$0xff]  ;;  %v779_v39 = vld [vmem:[%s1470_s4 + $0x28] sm:$0xff] }
 0x477   :  { %v600_v43 = vmul.f32 %v1085_v12, %v598_v41  ;;  %v780_v41 = vld [vmem:[%s1470_s4 + $0x30] sm:$0xff]  ;;  %v781_v12 = vld [vmem:[%s1470_s4 + $0x38] sm:$0xff] }
 0x478   :  { %v603_v46 = vmul.f32 %v601_v14, %v441_v40  ;;  %v1058_v40 = vpack.c.bf16 %v779_v39, %v778_v36  ;;  %v1062_v14 = vpack.c.bf16 %v781_v12, %v780_v41 }
 0x479   :  { %v602_v48 = vmul.f32 %v600_v43, %v440_v42 }
 0x47a   :  { %v605_v49 = vadd.f32 %v603_v46, %v443_v44 }
 0x47b   :  { %v604_v50 = vadd.f32 %v602_v48, %v442_v45 }
 0x47c   :  { %v610_v47 = vadd.f32 %v605_v49, %v1287_v29 }
 0x47d   :  { %v609_v51 = vadd.f32 %v604_v50, %v1284_v28 }
 0x47f   :  { %v1046_v52 = vpack.c.bf16 %v610_v47, %v609_v51 }
 0x481   :  { %1047 = vmatprep.subr.bf16.mxu0 %v1046_v52 }
 0x482   :  { %1049 = vmatpush3.bf16.msra.mxu0 %v1046_v52 }
 0x483   :  { %1051 = vmatprep.subr.bf16.mxu0 %v1050_v34 }
 0x485   :  { %997 = vmatmul.mubr.msk.f32.vlgmr.msra.gmra.mrb[2].mxu0 %vm283_vm1, %v901_v54 }
 0x486   :  { %1053 = vmatpush3.bf16.msra.mxu0 %v1050_v34 }
 0x4e6   :  { %v733_v55 = vpop.xlane.xlu1 %732 }
 0x4e7   :  { %v735_v59 = vmul.f32 0.03125, %v733_v55 }
 0x4e8   :  { %v730_v57 = vpop.xlane.xlu0 %729 }
 0x4e9   :  { %v747_v60 = vmul.f32 %v735_v59, %v735_v59  ;;  %v734_v63 = vmul.f32 0.03125, %v730_v57  ;;  %v755_v18 = vsub.f32 %v1336_v53, %v735_v59 }
 0x4ea   :  { %v743_v58 = vpop.xlane.xlu1 %742 }
 0x4eb   :  { %v745_v61 = vmul.f32 0.03125, %v743_v58  ;;  %v746_v1 = vmul.f32 %v734_v63, %v734_v63  ;;  %v754_v22 = vsub.f32 %v1339_v56, %v734_v63 }
 0x4ec   :  { %v740_v62 = vpop.xlane.xlu0 %739 }
 0x4ed   :  { %v749_v0 = vsub.f32 %v745_v61, %v747_v60  ;;  %v744_v2 = vmul.f32 0.03125, %v740_v62  ;;  %v445_v61 = vld [vmem:[%s1469_s3 + $0xd8] sm:$0xff] }
 0x4ef   :  { %v751_v4 = vadd.f32 1e-05, %v749_v0  ;;  %v748_v5 = vsub.f32 %v744_v2, %v746_v1  ;;  %v444_v0 = vld [vmem:[%s1469_s3 + $0xd0] sm:$0xff]  ;;  %v447_v1 = vld [vmem:[%s1469_s3 + $0xe8] sm:$0xff] }
 0x4f1   :  { %1086 = vrsqrt.f32 %v751_v4  ;;  %v750_v6 = vadd.f32 1e-05, %v748_v5  ;;  %v446_v5 = vld [vmem:[%s1469_s3 + $0xe0] sm:$0xff] }
 0x4f3   :  { %1088 = vrsqrt.f32 %v750_v6 }
 0x4fb   :  { %v1087_v16 = vpop.eup %1086 }
 0x4fc   :  { %v757_v19 = vmul.f32 %v1087_v16, %v755_v18 }
 0x4fd   :  { %v1089_v21 = vpop.eup %1088 }
 0x4fe   :  { %v759_v23 = vmul.f32 %v757_v19, %v449_v20  ;;  %v756_v25 = vmul.f32 %v1089_v21, %v754_v22 }
 0x500   :  { %v761_v53 = vadd.f32 %v759_v23, %v451_v24  ;;  %v758_v27 = vmul.f32 %v756_v25, %v448_v26 }
 0x502   :  { %v763_v30 = vadd.f32 %v761_v53, %v1298_v38  ;;  %v760_v56 = vadd.f32 %v758_v27, %v450_v31  ;;  %v776_v38 = vld [vmem:[%s1470_s4 + $0x10] sm:$0xff] }
 0x504   :  { %v762_v32 = vadd.f32 %v760_v56, %v1295_v37  ;;  %v777_v37 = vld [vmem:[%s1470_s4 + $0x18] sm:$0xff] }
 0x505   :  { %v1054_v35 = vpack.c.bf16 %v777_v37, %v776_v38 }
 0x507   :  { %1055 = vmatprep.subr.bf16.mxu0 %v1054_v35 }
 0x508   :  { %1057 = vmatpush3.bf16.msra.mxu0 %v1054_v35 }
 0x509   :  { %1059 = vmatprep.subr.bf16.mxu0 %v1058_v40 }
 0x50c   :  { %1061 = vmatpush3.bf16.msra.mxu0 %v1058_v40 }
 0x50d   :  { %1063 = vmatprep.subr.bf16.mxu0 %v1062_v14 }
 0x510   :  { %1065 = vmatpush3.bf16.msra.mxu0 %v1062_v14 }
 0x558   :  { %v1372_v7 = vpop.f32.mrb[2].mxu0 }
 0x559   :  { %v1374_v8 = vpop.f32.mrb[3].mxu0  ;;  %v695_v9 = vsel %vm29_vm0, %v1372_v7, 0.0  ;;  %v701_v10 = vmul.f32 %v1372_v7, %v1372_v7 }
 0x55a   :  { %696 = vadd.xlane.f32.xlu1 %v695_v9  ;;  %v692_v11 = vsel %vm29_vm0, %v1374_v8, 0.0  ;;  %v700_v13 = vmul.f32 %v1374_v8, %v1374_v8 }
 0x55b   :  { %693 = vadd.xlane.f32.xlu0 %v692_v11  ;;  %v705_v15 = vsel %vm29_vm0, %v701_v10, 0.0 }
 0x55c   :  { %v702_v17 = vsel %vm29_vm0, %v700_v13, 0.0 }
 0x55e   :  { %706 = vadd.xlane.f32.xlu1 %v705_v15 }
 0x55f   :  { %703 = vadd.xlane.f32.xlu0 %v702_v17  ;;  %v783_v17 = vld [vmem:[%s1470_s4 + $0x48] sm:$0xff] }
 0x56f   :  { %768 = vrot.lane.b32.xlu1 %v763_v30, %s1118_s26 }
 0x575   :  { %766 = vrot.lane.b32.xlu0 %v762_v32, %s1118_s26  ;;  %s1119_s26 = smov [#allocation2]  }
 0x576   :  { %s873_s27 = sshll.u32 %s1119_s26, 4  ;;  %s874_s27 = int_to_ptr.vmem [resolvable:$true] %s873_s27 }
 0x577   :  { %s1094_s28 = scalar_lea.vmem %s874_s27, 256  ;;  %p1099_p1 = scmp.lt.s32.totalorder %s874_s27, %s874_s27 }
 0x578   :  { %p1095_p0 = scmp.ne.s32.totalorder %s874_s27, %s1094_s28  ;;  %p1100_p2 = scmp.lt.s32.totalorder %s1094_s28, %s1094_s28 }
 0x57a   :  { %p1101_p3 = por %p1100_p2, %p1099_p1 }
 0x57c   :  { %p1102_p4 = pnand %p1101_p3, %p1095_p0 }
 0x5e7   :  { %v697_v42 = vpop.xlane.xlu1 %696 }
 0x5e8   :  { %v699_v43 = vmul.f32 0.03125, %v697_v42  ;;  %v694_v44 = vpop.xlane.xlu0 %693 }
 0x5e9   :  { %v698_v46 = vmul.f32 0.03125, %v694_v44 }
 0x5ea   :  { %v711_v48 = vmul.f32 %v699_v43, %v699_v43  ;;  %v719_v58 = vsub.f32 %v1372_v7, %v699_v43 }
 0x5eb   :  { %v707_v45 = vpop.xlane.xlu1 %706  ;;  %v710_v47 = vmul.f32 %v698_v46, %v698_v46  ;;  %v718_v60 = vsub.f32 %v1374_v8, %v698_v46 }
 0x5ec   :  { %v709_v49 = vmul.f32 0.03125, %v707_v45  ;;  %v704_v50 = vpop.xlane.xlu0 %703 }
 0x5ed   :  { %v708_v51 = vmul.f32 0.03125, %v704_v50 }
 0x5ee   :  { %v713_v52 = vsub.f32 %v709_v49, %v711_v48 }
 0x5ef   :  { %v712_v54 = vsub.f32 %v708_v51, %v710_v47  ;;  %v769_v13 = vpop.permute.xlu1 %768 }
 0x5f0   :  { %v715_v55 = vadd.f32 1e-05, %v713_v52  ;;  %v767_v11 = vpop.permute.xlu0 %766 }
 0x5f1   :  { %v714_v57 = vadd.f32 1e-05, %v712_v54 }
 0x5f2   :  { %1090 = vrsqrt.f32 %v715_v55 }
 0x5f3   :  { %1092 = vrsqrt.f32 %v714_v57 }
 0x5fc   :  { %v1091_v59 = vpop.eup %1090 }
 0x5fd   :  { %v1093_v62 = vpop.eup %1092  ;;  %v721_v63 = vmul.f32 %v1091_v59, %v719_v58 }
 0x5fe   :  { %v720_v2 = vmul.f32 %v1093_v62, %v718_v60 }
 0x5ff   :  { %v723_v4 = vmul.f32 %v721_v63, %v445_v61 }
 0x600   :  { %v722_v6 = vmul.f32 %v720_v2, %v444_v0 }
 0x601   :  { %v725_v7 = vadd.f32 %v723_v4, %v447_v1 }
 0x602   :  { %v724_v8 = vadd.f32 %v722_v6, %v446_v5 }
 0x603   :  { %v727_v9 = vadd.f32 %v725_v7, %v1287_v29  ;;  %v782_v29 = vld [vmem:[%s1470_s4 + $0x40] sm:$0xff] }
 0x604   :  { %v726_v10 = vadd.f32 %v724_v8, %v1284_v28 }
 0x605   :  { %v773_v16 = vsel %vm29_vm0, %v727_v9, %v769_v13 }
 0x606   :  { %v772_v15 = vsel %vm29_vm0, %v726_v10, %v767_v11 }
 0x607   :  { %1015 = vmatprep.mubr.msk.f32.mxu0 %vm784_vm2, %v772_v15 }
 0x608   :  { %1016 = vmatmul.mubr.msk.f32.vlgmr.msra.gmra.mrb[4].mxu0 %vm784_vm2, %v773_v16 }
 0x6db   :  { %v1017_v28 = vpop.f32.mrb[4].mxu0 }
 0x6dc   :  { %v863_v18 = vadd.f32 %v1017_v28, %v783_v17  ;;  %v857_v19 = vpop.f32.mrb[5].mxu0 }
 0x6dd   :  { %v858_v20 = vadd.f32 %v857_v19, %v782_v29 }
 0x6de   :  { %867 = vst.msk [vmem:[#allocation2 + $0x8] sm:$0xff] %vm784_vm2, %v863_v18 }
 0x6df   :  { %866 = vst.msk [vmem:[#allocation2] sm:$0xff] %vm784_vm2, %v858_v20 }
 0x6e0   :  { %1105 = shalt.err (!%p1102_p4)
}
 0x6e1   :  { %s1106_s30 = scalar_lea.hbm %s1471_s5, 256 }
 0x6e2   :  { %p1107_p5 = scmp.ne.s32.totalorder %s1471_s5, %s1106_s30  ;;  %p1110_p6 = scmp.lt.u32.totalorder %s1106_s30, %s1471_s5 }
 0x6e4   :  { %p1112_p7 = pnand %p1110_p6, %p1107_p5 }
 0x6e6   :  { %1115 = shalt.err (!%p1112_p7)
}
 0x6e7   :  { %s1120_s10 = smov 128   ;;  %s1121_s1 = smov 8  }
 0x6e8   :  { %879 = dma.vmem_to_hbm [thread:$0]  %s874_s27, 256, %s1471_s5, [#allocation3], %s1120_s10, %s1120_s10, %s1121_s1  }
 0x6e9   :  { %1116 = dma.done.wait [#allocation3], 256  }
 0x6ea   :  { %1117 = vsyncadd [#allocation3], 4294967040 }
 0x6eb   :  { %883 = vsyncpa [#allocation3], 1 }

</bundles_post_ra>
